<compile_context>
chip_gen: v7x
topology: tpu7x:2x2x1
jax: 0.10.0
libtpu: 0.0.40
codegen_flags: <defaults>
</compile_context>

<pallas_src>
import functools

import jax
import jax.numpy as jnp
from jax.experimental import pallas as pl
from jax.experimental.pallas import tpu as pltpu

NUM_ACTION = 2
NUM_LATENT = 1
NUM_STATES = 3
INPUT_DIM = NUM_STATES + NUM_ACTION + NUM_LATENT  # 6

LANE = 128            # TPU lane width (last-dim tiling unit)
MIN_GRID_STEPS = 4    # keep both v7x TCs busy and >=2 steps/core for pipelining
BYTES_PER_LANE = 320  # ~VMEM bytes per batch lane: x/out double buffers (2*32 + 2*32)
                      # + f32 hidden (128) + optional bf16 hidden copy (64)


def _round_up(n, m):
    return ((n + m - 1) // m) * m


def _round_down(n, m):
    return (n // m) * m


def _default_cast_h_bf16():
    # bf16 hidden halves the biggest VMEM intermediate and feeds the MXU
    # natively on v6e/v7x; keep f32 on v5e (no bf16 VPU/EUP) / unknown chips.
    try:
        kind = jax.devices()[0].device_kind.lower()
    except Exception:
        return False
    return ("v6" in kind) or ("v7" in kind)


def _mlp_kernel(xT_ref, w1_ref, b1_ref, w2_ref, b2_ref, oT_ref, *, cast_h_bf16):
    # Lane-dense transposed math (batch on the 128-lane axis):
    #   h^T = tanh(W1 @ x^T + b1)   -> [hidden, TB]
    #   y^T = W2 @ h^T + b2         -> [out,    TB]
    # Two small MXU dots, VPU bias adds, EUP tanh; no scratch needed.
    xT = xT_ref[...]
    h = jnp.dot(w1_ref[...], xT, preferred_element_type=jnp.float32) + b1_ref[...]
    h = jnp.tanh(h)
    if cast_h_bf16:
        y = jnp.dot(w2_ref[...].astype(jnp.bfloat16), h.astype(jnp.bfloat16),
                    preferred_element_type=jnp.float32)
    else:
        y = jnp.dot(w2_ref[...], h, preferred_element_type=jnp.float32)
    oT_ref[...] = (y + b2_ref[...]).astype(oT_ref.dtype)


def _choose_batch_tile(batch, block_batch, vmem_limit_bytes):
    b_lane = _round_up(batch, LANE)
    # VMEM guard: keep ~25% headroom inside the scoped limit.
    vmem_cap = max(LANE, _round_down((vmem_limit_bytes * 3 // 4) // BYTES_PER_LANE, LANE))
    tb = min(_round_up(block_batch, LANE), b_lane, vmem_cap)
    # Don't collapse the grid on large batches: keep >= MIN_GRID_STEPS steps so
    # both v7x TensorCores get work and DMA stays double-buffered.
    if b_lane >= MIN_GRID_STEPS * LANE:
        tb = min(tb, _round_up(pl.cdiv(b_lane, MIN_GRID_STEPS), LANE))
    return max(tb, LANE)


def ts_single_mlp(x, w1, b1, w2, b2, *, block_batch=64 * 1024,
                  x_batch_last=False, return_batch_last=False,
                  cast_h_bf16=None, small_batch_threshold=4096,
                  vmem_limit_bytes=48 << 20):
    """tsSingleMLP forward: y = tanh(x @ w1 + b1) @ w2 + b2.

    x : [B, input_dim]            (or [input_dim, B] if x_batch_last=True)
    w1: [input_dim, hidden_dim]   (== PyTorch fc1.weight.T)
    b1: [hidden_dim]
    w2: [hidden_dim, output_dim]  (== PyTorch fc2.weight.T)
    b2: [output_dim]
    returns [B, output_dim]       (or [output_dim, B] if return_batch_last=True)
    """
    if x_batch_last:
        in_dim, B = x.shape
    else:
        B, in_dim = x.shape
    hidden_dim = w1.shape[1]
    out_dim = w2.shape[1]

    # Small-batch fast path: the XLA fusion is strictly cheaper than the
    # pad + transpose + pallas_call fixed cost.
    if B < small_batch_threshold:
        x_bf = x.T if x_batch_last else x
        y = jnp.tanh(x_bf @ w1 + b1) @ w2 + b2
        return y.T if return_batch_last else y

    if cast_h_bf16 is None:
        cast_h_bf16 = _default_cast_h_bf16()

    tb = _choose_batch_tile(B, block_batch, vmem_limit_bytes)
    b_pad = _round_up(B, tb)
    grid = (b_pad // tb,)

    # Lane-dense, transposed operands: batch on the last (lane) axis.
    # If the producer already emits batch-last, pass x_batch_last=True and this
    # transpose (a full extra HBM read+write of x) disappears.
    xT = x if x_batch_last else x.T               # [in_dim, B]
    if b_pad != B:
        xT = jnp.pad(xT, ((0, 0), (0, b_pad - B)))  # padded lanes compute garbage; sliced off below
    w1T = w1.T                                      # [hidden, in]   (== fc1.weight)
    w2T = w2.T                                      # [out, hidden]  (== fc2.weight)
    b1_col = b1.reshape(hidden_dim, 1)              # broadcasts over the lane (batch) axis
    b2_col = b2.reshape(out_dim, 1)

    kernel = functools.partial(_mlp_kernel, cast_h_bf16=cast_h_bf16)

    yT = pl.pallas_call(
        kernel,
        out_shape=jax.ShapeDtypeStruct((out_dim, b_pad), x.dtype),
        grid_spec=pl.GridSpec(
            grid=grid,
            in_specs=[
                pl.BlockSpec((in_dim, tb), lambda i: (0, i)),           # x^T tile (pipelined)
                pl.BlockSpec((hidden_dim, in_dim), lambda i: (0, 0)),   # W1 VMEM-resident
                pl.BlockSpec((hidden_dim, 1), lambda i: (0, 0)),        # b1 resident
                pl.BlockSpec((out_dim, hidden_dim), lambda i: (0, 0)),  # W2 resident
                pl.BlockSpec((out_dim, 1), lambda i: (0, 0)),           # b2 resident
            ],
            out_specs=pl.BlockSpec((out_dim, tb), lambda i: (0, i)),
        ),
        compiler_params=pltpu.CompilerParams(
            dimension_semantics=("parallel",),   # batch tiles shard across v7x's 2 TCs
            vmem_limit_bytes=vmem_limit_bytes,   # allow the large batch tiles
        ),
    )(xT, w1T, b1_col, w2T, b2_col)

    if return_batch_last:
        return yT[:, :B]   # [out_dim, B] -- padded batch lanes dropped
    return yT.T[:B]        # [B, out_dim] (original nn.Module layout)


def init_params(key, input_dim, hidden_dim, output_dim):
    """Deterministic init mimicking nn.Linear's uniform(-1/sqrt(fan_in), +)."""
    k1, k2, k3, k4 = jax.random.split(key, 4)
    lim1 = 1.0 / jnp.sqrt(jnp.float32(input_dim))
    lim2 = 1.0 / jnp.sqrt(jnp.float32(hidden_dim))
    # Stored as [in, out] (the wrapper re-transposes the tiny weights as needed).
    w1 = jax.random.uniform(k1, (input_dim, hidden_dim), jnp.float32, -lim1, lim1)
    b1 = jax.random.uniform(k2, (hidden_dim,), jnp.float32, -lim1, lim1)
    w2 = jax.random.uniform(k3, (hidden_dim, output_dim), jnp.float32, -lim2, lim2)
    b2 = jax.random.uniform(k4, (output_dim,), jnp.float32, -lim2, lim2)
    return w1, b1, w2, b2


if __name__ == "__main__":
    key = jax.random.PRNGKey(0)
    kx, kp = jax.random.split(key)

    batch = 512               # small demo shape; lane-aligned -> tb=128, grid=(4,)
    hidden_dim = 32
    output_dim = NUM_STATES   # next-state prediction head

    x = jax.random.normal(kx, (batch, INPUT_DIM), jnp.float32)
    w1, b1, w2, b2 = init_params(kp, INPUT_DIM, hidden_dim, output_dim)

    # Force the Pallas path (batch is below the normal fast-path threshold) and
    # keep the hidden activation in f32 for a tight numerical check.
    out = ts_single_mlp(x, w1, b1, w2, b2,
                        small_batch_threshold=0, cast_h_bf16=False)
    out = jax.block_until_ready(out)

    # Reference check in plain JAX.
    ref = jnp.tanh(x @ w1 + b1) @ w2 + b2
    assert out.shape == (batch, output_dim)
    # f32 MXU dots may use a different pass decomposition than the XLA
    # reference; 2e-3 abs/rel covers both paths while remaining a real check.
    assert jnp.allclose(out, ref, atol=2e-3, rtol=2e-3), float(jnp.max(jnp.abs(out - ref)))

    print("KERNEL_OK")
</pallas_src>

<mosaic_0001>
module attributes {stable_mosaic.version = 11 : i64} {
  func.func @_mlp_kernel(%arg0: i32, %arg1: memref<6x128xf32, #tpu.memory_space<vmem>>, %arg2: memref<32x6xf32, #tpu.memory_space<vmem>>, %arg3: memref<32x1xf32, #tpu.memory_space<vmem>>, %arg4: memref<3x32xf32, #tpu.memory_space<vmem>>, %arg5: memref<3x1xf32, #tpu.memory_space<vmem>>, %arg6: memref<3x128xf32, #tpu.memory_space<vmem>>) attributes {dimension_semantics = [#tpu.dimension_semantics<parallel>], iteration_bounds = array<i64: 4>, scalar_prefetch = 0 : i64, scratch_operands = 0 : i64, tpu.core_type = #tpu.core_type<tc>, window_params = [{transform_indices = @transform_0, window_bounds = array<i64: 6, 128>}, {pipeline_mode = #tpu.pipeline_mode<synchronous>, transform_indices = @transform_1, window_bounds = array<i64: 32, 6>}, {pipeline_mode = #tpu.pipeline_mode<synchronous>, transform_indices = @transform_2, window_bounds = array<i64: 32, 1>}, {pipeline_mode = #tpu.pipeline_mode<synchronous>, transform_indices = @transform_3, window_bounds = array<i64: 3, 32>}, {pipeline_mode = #tpu.pipeline_mode<synchronous>, transform_indices = @transform_4, window_bounds = array<i64: 3, 1>}, {transform_indices = @transform_5, window_bounds = array<i64: 3, 128>}]} {
    %c0 = arith.constant 0 : index
    %c0_0 = arith.constant 0 : index
    %0 = vector.load %arg1[%c0, %c0_0] : memref<6x128xf32, #tpu.memory_space<vmem>>, vector<6x128xf32>
    %c0_1 = arith.constant 0 : index
    %c0_2 = arith.constant 0 : index
    %1 = vector.load %arg2[%c0_1, %c0_2] : memref<32x6xf32, #tpu.memory_space<vmem>>, vector<32x6xf32>
    %cst = arith.constant dense<0.000000e+00> : vector<32x128xf32>
    %2 = tpu.matmul %1, %0, %cst {dimension_numbers = #tpu.dot_dimension_numbers<[1], [0], [0], [1], [0, 0, 1, 1], [], []>} : vector<32x6xf32>, vector<6x128xf32>, vector<32x128xf32> -> vector<32x128xf32>
    %c0_3 = arith.constant 0 : index
    %c0_4 = arith.constant 0 : index
    %3 = vector.load %arg3[%c0_3, %c0_4] : memref<32x1xf32, #tpu.memory_space<vmem>>, vector<32x1xf32>
    %4 = vector.broadcast %3 : vector<32x1xf32> to vector<32x128xf32>
    %5 = arith.addf %2, %4 : vector<32x128xf32>
    %6 = math.tanh %5 : vector<32x128xf32>
    %c0_5 = arith.constant 0 : index
    %c0_6 = arith.constant 0 : index
    %7 = vector.load %arg4[%c0_5, %c0_6] : memref<3x32xf32, #tpu.memory_space<vmem>>, vector<3x32xf32>
    %cst_7 = arith.constant dense<0.000000e+00> : vector<3x128xf32>
    %8 = tpu.matmul %7, %6, %cst_7 {dimension_numbers = #tpu.dot_dimension_numbers<[1], [0], [0], [1], [0, 0, 1, 1], [], []>} : vector<3x32xf32>, vector<32x128xf32>, vector<3x128xf32> -> vector<3x128xf32>
    %c0_8 = arith.constant 0 : index
    %c0_9 = arith.constant 0 : index
    %9 = vector.load %arg5[%c0_8, %c0_9] : memref<3x1xf32, #tpu.memory_space<vmem>>, vector<3x1xf32>
    %10 = vector.broadcast %9 : vector<3x1xf32> to vector<3x128xf32>
    %11 = arith.addf %8, %10 : vector<3x128xf32>
    %c0_10 = arith.constant 0 : index
    %c0_11 = arith.constant 0 : index
    %12 = vector.load %arg6[%c0_10, %c0_11] : memref<3x128xf32, #tpu.memory_space<vmem>>, vector<3x128xf32>
    tpu.vector_store %arg6[%c0_10, %c0_11], %11 {strides = array<i32>} : memref<3x128xf32, #tpu.memory_space<vmem>>, vector<3x128xf32>,
    return
  }
  func.func @transform_0(%arg0: i32) -> (i32, i32) {
    %c0_i32 = arith.constant 0 : i32
    %c0_i32_0 = arith.constant 0 : i32
    return %c0_i32, %arg0 : i32, i32
  }
  func.func @transform_1(%arg0: i32) -> (i32, i32) {
    %c0_i32 = arith.constant 0 : i32
    %c0_i32_0 = arith.constant 0 : i32
    %c0_i32_1 = arith.constant 0 : i32
    return %c0_i32, %c0_i32_0 : i32, i32
  }
  func.func @transform_2(%arg0: i32) -> (i32, i32) {
    %c0_i32 = arith.constant 0 : i32
    %c0_i32_0 = arith.constant 0 : i32
    %c0_i32_1 = arith.constant 0 : i32
    return %c0_i32, %c0_i32_0 : i32, i32
  }
  func.func @transform_3(%arg0: i32) -> (i32, i32) {
    %c0_i32 = arith.constant 0 : i32
    %c0_i32_0 = arith.constant 0 : i32
    %c0_i32_1 = arith.constant 0 : i32
    return %c0_i32, %c0_i32_0 : i32, i32
  }
  func.func @transform_4(%arg0: i32) -> (i32, i32) {
    %c0_i32 = arith.constant 0 : i32
    %c0_i32_0 = arith.constant 0 : i32
    %c0_i32_1 = arith.constant 0 : i32
    return %c0_i32, %c0_i32_0 : i32, i32
  }
  func.func @transform_5(%arg0: i32) -> (i32, i32) {
    %c0_i32 = arith.constant 0 : i32
    %c0_i32_0 = arith.constant 0 : i32
    return %c0_i32, %arg0 : i32, i32
  }
}

</mosaic_0001>

<bundles_post_ra>
// kernel: tpu_custom_call.1
= control target key start
LH: loop header
LB: loop body
LE: loop exit
PB: predicated region body
PF: predicated region fallthrough
CT: control target
= control target key end

     0   :  { %10 = vsyncpa [#allocation3], 0  ;;  %s847_s0 = inlined_call_operand.vmem [shape: f32[6,512], index: 0, kind: input, shape index: {}]   ;;  %s848_s1 = inlined_call_operand.vmem [shape: f32[32,6], index: 1, kind: input, shape index: {}]   ;;  %s849_s2 = inlined_call_operand.vmem [shape: f32[32,1], index: 2, kind: input, shape index: {}]   ;;  %s850_s3 = inlined_call_operand.vmem [shape: f32[3,32], index: 3, kind: input, shape index: {}]   ;;  %s851_s4 = inlined_call_operand.vmem [shape: f32[3,1], index: 4, kind: input, shape index: {}]   ;;  %s852_s5 = inlined_call_operand.hbm [shape: f32[3,512], index: 5, kind: output, shape index: {}]  }
   0x1   :  { %12 = vsyncpa [#allocation3 + $0x1], 0  ;;  %s713_s18 = smov 0   ;;  %s715_s19 = smov 0  }
   0x2   :  { %s717_s20 = smov 0   ;;  %s719_s21 = smov 0  }
   0x3 LB: > { %s734_s22 = sadd.s32 4294967295, %s676_s21   ;;  %s510_s23 = sadd.s32 4294967294, %s676_s21   ;;  %s676_s21 = sphi %s719_s21, %s858_s21   ;;  %s672_s20 = sphi %s717_s20, %s857_s20   ;;  %s668_s19 = sphi %s715_s19, %s856_s19   ;;  %s664_s18 = sphi %s713_s18, %s855_s18  }
   0x4   : > { %s738_s24 = sadd.s32 1, %s676_s21   ;;  %s135_s25 = sadd.s32 1, %s672_s20 }
   0x5   : > { %s132_s26 = ssub.s32 %s676_s21, %s738_s24  ;;  %p145_p0 = scmp.ne.s32.totalorder %s672_s20, %s668_s19 }
   0x6   : > { %p133_p1 = scmp.eq.s32.totalorder %s132_s26, 0  ;;  %p146_p2 = scmp.eq.s32.totalorder %s734_s22, 3 }
   0x7   : > { %p151_p3 = scmp.ne.s32.totalorder %s668_s19, %s664_s18  ;;  %p152_p4 = scmp.eq.s32.totalorder %s510_s23, 3 }
   0x8   : > { %s749_s27 = scalar_select %p133_p1, %s672_s20, %s135_s25  }
   0x9   : > { %p751_p5 = por %p146_p2, %p145_p0  ;;  %p755_p6 = por %p152_p4, %p151_p3 }
   0xa   : > { %p513_p7 = scmp.ge.s32.totalorder %s676_s21, 1  ;;  %p189_p8 = scmp.lt.s32.totalorder %s676_s21, 5 }
   0xc   : > { %p190_p9 = pnand %p513_p7, %p189_p8 }
   0xd   : > { %p216_p10 = scmp.lt.s32.totalorder (!%p190_p9), %s734_s22, 3  ;;  %v221_v0 = vld [vmem:[%s848_s1] sm:$0xff] (!%p190_p9)  ;;  %vm249_vm0 = vcmask (!%p190_p9), 48128   ;;  %v678_v2 = vmov (!%p190_p9), 0   ;;  %v227_v3 = vld [vmem:[%s849_s2 + $0x10] sm:$0xff] (!%p190_p9)  ;;  %vm262_vm1 = vcmask (!%p190_p9), 1045504  }
   0xe   : > { %193 = sbr.rel (%p190_p9) target bundleno = 491 (0x1eb), region = 40  ;;  %538 = vmatprep.mubr.msk.f32.mxu0 (!%p190_p9), %vm249_vm0, %v221_v0  ;;  %v225_v1 = vld [vmem:[%s849_s2] sm:$0xff] (!%p190_p9)  ;;  %604 = vset.pattern.permute.xlu0 (!%p190_p9), %v678_v2  ;;  %v226_v4 = vld [vmem:[%s849_s2 + $0x8] sm:$0xff] (!%p190_p9)  ;;  %v228_v5 = vld [vmem:[%s849_s2 + $0x18] sm:$0xff] (!%p190_p9)  ;;  %v679_v11 = vmov (!%p190_p9), 0.0|0.0   ;;  %vm680_vm2 = vmmov (!%p190_p9), 0  }
   0xf   : > { %605 = vset.pattern.permute.xlu1 (!%p190_p9), %v678_v2  ;;  %231 = vperm.xlu0 (!%p190_p9), %604, %v225_v1   ;;  %v222_v7 = vld [vmem:[%s848_s1 + $0x8] sm:$0xff] (!%p190_p9)  ;;  %v223_v8 = vld [vmem:[%s848_s1 + $0x10] sm:$0xff] (!%p190_p9)  ;;  %v356_v9 = vld [vmem:[%s851_s4] sm:$0x7] (!%p190_p9)  ;;  %v681_v12 = vmov (!%p190_p9), 0.0   ;;  %vm362_vm3 = vcmask (!%p190_p9), 261120  }
  0x10   : > { %241 = vperm.xlu1 (!%p190_p9), %605, %v227_v3   ;;  %v224_v10 = vld [vmem:[%s848_s1 + $0x18] sm:$0xff] (!%p190_p9)  ;;  %555 = vmatprep.subr.bf16.mxu1 (!%p190_p9), %v679_v11  ;;  %v355_v31 = vld [vmem:[%s850_s3] sm:$0x7] (!%p190_p9)  ;;  %s213_s14 = sand.u32 (!%p190_p9), 1, %s668_s19   ;;  %s523_s16 = sshll.u32 (!%p190_p9), %s734_s22, 6 }
  0x11   : > { %552 = vmatprep.mubr.msk.f32.mxu1 (!%p190_p9), %vm680_vm2, %v681_v12  ;;  %s514_s15 = sshll.u32 (!%p190_p9), %s213_s14, 2  ;;  %s805_s30 = scalar_lea.hbm (!%p190_p9), %s852_s5, %s523_s16 }
  0x12   : > { %s438_s6 = scalar_lea.sflag (!%p190_p9), [#allocation3], %s213_s14 }
  0x13   : > { %236 = vperm.xlu0 (!%p190_p9), %604, %v226_v4  }
  0x14   : > { %246 = vperm.xlu1 (!%p190_p9), %605, %v228_v5  }
  0x15   : > { %s217_s9 = scalar_select %p216_p10, %s734_s22, 3 }
  0x16   : > { %s682_s22 = smov [#allocation2]  }
  0x17   : > { %s515_s12 = sshll.u32 %s217_s9, 3  ;;  %359 = vperm.xlu0 %604, %v356_v9   ;;  %s618_s8 = sshll.u32 %s682_s22, 4  ;;  %s619_s8 = int_to_ptr.vmem [resolvable:$false] %s618_s8 }
  0x18   : > { %s219_s17 = scalar_lea.vmem %s847_s0, %s515_s12  ;;  %s620_s9 = scalar_lea.vmem %s619_s8, 128 }
  0x19   : > { %v220_v6 = vld [vmem:[%s219_s17] sm:$0x3f]  ;;  %s215_s17 = scalar_lea.vmem [#allocation2], %s514_s15 }
  0x1a   : > { %536 = vmatprep.subr.msk.mxu0 %vm262_vm1, %v220_v6  ;;  %s451_s23 = sshll.u32 %s215_s17, 4  ;;  %s807_s23 = int_to_ptr.vmem [resolvable:$true] %s451_s23 }
  0x1b   : > { %537 = vmatpush3.msk.msra.mxu0 %vm262_vm1, %v220_v6  ;;  %s614_s7 = scalar_lea.vmem %s807_s23, 64  ;;  %p621_p0 = scmp.lt.s32.totalorder %s807_s23, %s619_s8 }
  0x1c   : > { %539 = vmatmul.mubr.msk.f32.vlgmr.msra.gmra.mrb[0].mxu0 %vm249_vm0, %v222_v7  ;;  %p615_p11 = scmp.ne.s32.totalorder %s807_s23, %s614_s7  ;;  %p622_p1 = scmp.lt.s32.totalorder %s620_s9, %s614_s7 }
  0x1d   : > { %541 = vmatprep.mubr.msk.f32.mxu0 %vm249_vm0, %v223_v8 }
  0x1e   : > { %p616_p12 = pnand %p615_p11, %p751_p5  ;;  %p623_p2 = por %p622_p1, %p621_p0 }
  0x20   : > { %542 = vmatmul.mubr.msk.f32.gmra.mrb[2].mxu0 %vm249_vm0, %v224_v10  ;;  %p617_p13 = pneg %p616_p12 }
  0x22   : > { %p624_p3 = pnand %p623_p2, %p617_p13 }
  0x8e   : > { %v232_v13 = vpop.permute.xlu0 %231 }
  0x8f   : > { %v242_v14 = vpop.permute.xlu1 %241 }
  0x92   : > { %v237_v15 = vpop.permute.xlu0 %236 }
  0x93   : > { %v247_v20 = vpop.permute.xlu1 %246 }
  0x96   : > { %v360_v32 = vpop.permute.xlu0 %359 }
  0xef   : > { %v540_v16 = vpop.f32.mrb[0].mxu0 }
  0xf0   : > { %v338_v17 = vadd.f32 %v540_v16, %v237_v15  ;;  %v332_v18 = vpop.f32.mrb[1].mxu0 }
  0xf1   : > { %v333_v19 = vadd.f32 %v332_v18, %v232_v13 }
  0xf2   : > { %606 = vtanh.f32 %v338_v17 }
  0xf3   : > { %608 = vtanh.f32 %v333_v19  ;;  %v543_v21 = vpop.f32.mrb[2].mxu0 }
  0xf4   : > { %v348_v22 = vadd.f32 %v543_v21, %v247_v20  ;;  %v342_v23 = vpop.f32.mrb[3].mxu0 }
  0xf5   : > { %v343_v24 = vadd.f32 %v342_v23, %v242_v14 }
  0xf6   : > { %610 = vtanh.f32 %v348_v22 }
  0xf7   : > { %612 = vtanh.f32 %v343_v24 }
  0xfc   : > { %v607_v25 = vpop.eup %606 }
  0xfd   : > { %v609_v26 = vpop.eup %608 }
  0xfe   : > { %v556_v27 = vpack.c.bf16 %v607_v25, %v609_v26 }
 0x100   : > { %v611_v28 = vpop.eup %610  ;;  %557 = vmatpush3.bf16.msra.mxu1 %v556_v27 }
 0x101   : > { %v613_v29 = vpop.eup %612  ;;  %558 = vmatprep.subr.bf16.mxu1 %v679_v11 }
 0x102   : > { %v559_v30 = vpack.c.bf16 %v611_v28, %v613_v29 }
 0x104   : > { %560 = vmatpush3.bf16.msra.mxu1 %v559_v30 }
 0x107   : > { %553 = vmatmul.mubr.msk.f32.vlgmr.msra.gmra.mrb[0].mxu1 %vm362_vm3, %v355_v31 }
 0x1da   : > { %v432_v33 = vpop.f32.mrb[0].mxu1 }
 0x1db   : > { %v433_v34 = vadd.f32 %v432_v33, %v360_v32  ;;  %v554_v35 = vpop.f32.mrb[1].mxu1 }
 0x1dd   : > { %436 = vst [vmem:[%s215_s17] sm:$0x7] %v433_v34 }
 0x1de   : > { %627 = shalt.err (!%p624_p3)
}
 0x1df   : > { %s628_s10 = scalar_lea.hbm %s805_s30, 64  ;;  %s632_s13 = scalar_lea.hbm %s852_s5, 256 }
 0x1e0   : > { %p629_p4 = scmp.ne.s32.totalorder %s805_s30, %s628_s10  ;;  %p633_p9 = scmp.lt.u32.totalorder %s805_s30, %s852_s5 }
 0x1e1   : > { %p634_p10 = scmp.lt.u32.totalorder %s632_s13, %s628_s10  ;;  %p636_p12 = scmp.lt.u32.totalorder %s628_s10, %s805_s30 }
 0x1e2   : > { %p630_p7 = pnand %p629_p4, %p751_p5 }
 0x1e3   : > { %p635_p11 = por %p634_p10, %p633_p9 }
 0x1e4   : > { %p631_p8 = pneg %p630_p7 }
 0x1e5   : > { %p637_p13 = por %p636_p12, %p635_p11 }
 0x1e7   : > { %p638_p0 = pnand %p637_p13, %p631_p8 }
 0x1e9   : > { %641 = shalt.err (!%p638_p0)
}
 0x1ea   : > { %561 = dma.vmem_to_hbm [thread:$0]  (%p751_p5), %s807_s23, 64, %s805_s30, %s438_s6  }
 0x1eb PF: > { %p567_p1 = scmp.ge.s32.totalorder %s676_s21, 2  ;;  %s463_s16 = sand.u32 1, %s664_s18  }
 0x1ec   : > { %s464_s17 = scalar_lea.sflag [#allocation3], %s463_s16 }
 0x1ed   : > { %p564_p2 = pnand %p567_p1, %p755_p6 }
 0x1ef   : > { %659 = dma.done.wait (!%p564_p2), %s464_s17, 64  }
 0x1f0   : > { %661 = vsyncadd (!%p564_p2), %s464_s17, 4294967232  ;;  %p15_p3 = scmp.ge.s32.totalorder %s738_s24, 6   ;;  %s855_s18 = smov %s668_s19 }
 0x1f1   : > { %s856_s19 = smov %s672_s20  ;;  %s857_s20 = smov %s749_s27 }
 0x1f2   : > { %s858_s21 = smov %s738_s24  ;;  %17 = sbr.rel (!%p15_p3) target bundleno = 3 (0x3), region = 75 }
 0x1f9   :  { %469 = vsyncpa [#allocation3], 1 }
 0x1fa   :  { %471 = vsyncpa [#allocation3 + $0x1], 1 }

</bundles_post_ra>
